<compile_context>
chip_gen: v6e
topology: v6e:2x2x1
jax: 0.10.0
libtpu: 0.0.40
codegen_flags: <defaults>
</compile_context>

<pallas_src>
import jax
import jax.numpy as jnp
from jax.experimental import pallas as pl
from jax.experimental.pallas import tpu as pltpu

_LANES = 128


def _sine_kernel(x_ref, o_ref):
    # Compute in f32 (accurate range reduction for bf16/f16 inputs); store in
    # the output dtype so HBM traffic stays at the narrow width.
    o_ref[...] = jnp.sin(x_ref[...].astype(jnp.float32)).astype(o_ref.dtype)


def _pick_block_rows(rows: int, block_rows: int) -> int:
    """Sublane-aligned block height aiming for >=4 pipeline steps."""
    br = min(block_rows, rows)
    if rows <= 8:
        return rows
    # >=4 grid steps: v7x shards the "parallel" grid across 2 TCs, so 4 total
    # steps keep >=2 per core (double-buffering intact); single-TC v5e/v6e get
    # DMA/compute overlap.  Keep blocks >=256 rows (128 KiB f32) when the
    # input is large enough, so per-step overhead (~0.35 us) stays amortized.
    quarter = -(-rows // 4)            # cdiv(rows, 4)
    quarter = -(-quarter // 8) * 8     # round up to sublane multiple
    floor_rows = 256 if rows >= 4 * 256 else 8
    br = min(br, max(quarter, floor_rows))
    br = min(br, rows)
    if br != rows:
        br = max(8, (br // 8) * 8)     # multiple of 8 unless full extent
    return br


def _sine_2d(x2d: jax.Array, out_dtype, block_rows: int) -> jax.Array:
    rows, lanes = x2d.shape
    br = _pick_block_rows(rows, block_rows)
    grid = (pl.cdiv(rows, br),)
    n = rows * lanes
    bytes_accessed = n * x2d.dtype.itemsize + n * jnp.dtype(out_dtype).itemsize

    return pl.pallas_call(
        _sine_kernel,
        out_shape=jax.ShapeDtypeStruct((rows, lanes), out_dtype),
        grid_spec=pltpu.PrefetchScalarGridSpec(
            num_scalar_prefetch=0,
            grid=grid,
            in_specs=[pl.BlockSpec((br, lanes), lambda i: (i, 0))],
            out_specs=pl.BlockSpec((br, lanes), lambda i: (i, 0)),
        ),
        compiler_params=pltpu.CompilerParams(
            dimension_semantics=("parallel",),
        ),
        cost_estimate=pl.CostEstimate(
            flops=0, transcendentals=n, bytes_accessed=bytes_accessed),
    )(x2d)


def sine_activation(x: jax.Array, *, block_rows: int = 4096) -> jax.Array:
    """Elementwise sin(x) via a Pallas TPU kernel (lane-dense HBM streaming)."""
    orig_shape = x.shape

    # torch.sin promotes integer/bool inputs to float; mirror that here.
    if jnp.issubdtype(x.dtype, jnp.floating):
        out_dtype = x.dtype
    else:
        out_dtype = jnp.float32
        x = x.astype(jnp.float32)

    n = x.size
    if n == 0:
        return jnp.zeros(orig_shape, out_dtype)

    if n % _LANES == 0:
        # Fast path (common NN case): zero-copy reshape to a lane-dense
        # (rows, 128) slab.  No padding, no post-slice; block DMAs are fully
        # contiguous in HBM.
        out2d = _sine_2d(x.reshape(n // _LANES, _LANES), out_dtype, block_rows)
        return out2d.reshape(orig_shape)

    # Ragged path: run the 128-aligned bulk through the kernel; the <128
    # element tail is computed with plain jnp.sin.  This avoids the old
    # full-tensor pad + slice round-trips through HBM.
    x_flat = x.reshape(-1)
    bulk = (n // _LANES) * _LANES
    tail = jnp.sin(x_flat[bulk:].astype(jnp.float32)).astype(out_dtype)
    if bulk == 0:
        return tail.reshape(orig_shape)
    head = _sine_2d(x_flat[:bulk].reshape(bulk // _LANES, _LANES),
                    out_dtype, block_rows)
    return jnp.concatenate([head.reshape(-1), tail]).reshape(orig_shape)


if __name__ == "__main__":
    key = jax.random.PRNGKey(0)

    # Shape consistent with an NCHW activation: batch=2, channels=4, 16x16.
    x = jax.random.normal(key, (2, 4, 16, 16), dtype=jnp.float32)
    y = jax.block_until_ready(sine_activation(x))
    y_ref = jnp.sin(x)
    assert y.shape == x.shape and y.dtype == x.dtype
    assert jnp.allclose(y, y_ref, atol=1e-6, rtol=1e-6)

    # Ragged-size smoke test (n % 128 != 0) exercising the bulk + tail path.
    x2 = jax.random.normal(jax.random.PRNGKey(1), (5, 40), dtype=jnp.float32)
    y2 = jax.block_until_ready(sine_activation(x2))
    assert y2.shape == x2.shape and y2.dtype == x2.dtype
    assert jnp.allclose(y2, jnp.sin(x2), atol=1e-6, rtol=1e-6)

    print("KERNEL_OK")
</pallas_src>

<mosaic_0001>
module attributes {stable_mosaic.version = 11 : i64} {
  func.func @_sine_kernel(%arg0: i32, %arg1: memref<8x128xf32, #tpu.memory_space<vmem>>, %arg2: memref<8x128xf32, #tpu.memory_space<vmem>>) attributes {dimension_semantics = [#tpu.dimension_semantics<parallel>], iteration_bounds = array<i64: 2>, scalar_prefetch = 0 : i64, scratch_operands = 0 : i64, tpu.core_type = #tpu.core_type<tc>, window_params = [{transform_indices = @transform_0, window_bounds = array<i64: 8, 128>}, {transform_indices = @transform_1, window_bounds = array<i64: 8, 128>}]} {
    %c0 = arith.constant 0 : index
    %c0_0 = arith.constant 0 : index
    %0 = vector.load %arg1[%c0, %c0_0] : memref<8x128xf32, #tpu.memory_space<vmem>>, vector<8x128xf32>
    %1 = math.sin %0 : vector<8x128xf32>
    %c0_1 = arith.constant 0 : index
    %c0_2 = arith.constant 0 : index
    %2 = vector.load %arg2[%c0_1, %c0_2] : memref<8x128xf32, #tpu.memory_space<vmem>>, vector<8x128xf32>
    tpu.vector_store %arg2[%c0_1, %c0_2], %1 {strides = array<i32>} : memref<8x128xf32, #tpu.memory_space<vmem>>, vector<8x128xf32>,
    return
  }
  func.func @transform_0(%arg0: i32) -> (i32, i32) {
    %c0_i32 = arith.constant 0 : i32
    %c0_i32_0 = arith.constant 0 : i32
    return %arg0, %c0_i32 : i32, i32
  }
  func.func @transform_1(%arg0: i32) -> (i32, i32) {
    %c0_i32 = arith.constant 0 : i32
    %c0_i32_0 = arith.constant 0 : i32
    return %arg0, %c0_i32 : i32, i32
  }
}

</mosaic_0001>

<bundles_post_ra>
// kernel: tpu_custom_call.1
= control target key start
LH: loop header
LB: loop body
LE: loop exit
PB: predicated region body
PF: predicated region fallthrough
CT: control target
= control target key end

     0   :  { %6 = vsyncpa [#allocation3], 0  ;;  %s682_s0 = inlined_call_operand.hbm [shape: f32[16,128], index: 0, kind: input, shape index: {}]   ;;  %s683_s1 = inlined_call_operand.hbm [shape: f32[16,128], index: 1, kind: output, shape index: {}]  }
   0x1   :  { %8 = vsyncpa [#allocation3 + $0x1], 0 }
   0x2   :  { %9 = vsyncpa [#allocation4], 0 }
   0x3   :  { %11 = vsyncpa [#allocation4 + $0x1], 0  ;;  %s510_s6 = smov 0   ;;  %s512_s7 = smov 0  }
   0x4   :  { %s514_s8 = smov 0   ;;  %s516_s9 = smov 0  }
   0x5 LB: > { %s531_s10 = sadd.s32 4294967295, %s490_s9   ;;  %s322_s11 = sadd.s32 4294967294, %s490_s9   ;;  %s490_s9 = sphi %s516_s9, %s700_s9   ;;  %s486_s8 = sphi %s514_s8, %s699_s8   ;;  %s482_s7 = sphi %s512_s7, %s698_s7   ;;  %s478_s6 = sphi %s510_s6, %s697_s6  }
   0x6   : > { %s535_s12 = sadd.s32 1, %s490_s9   ;;  %s24_s13 = sadd.s32 1, %s486_s8 }
   0x7   : > { %s21_s14 = ssub.s32 %s490_s9, %s535_s12  ;;  %p31_p0 = scmp.ne.s32.totalorder %s486_s8, %s482_s7 }
   0x8   : > { %p22_p1 = scmp.eq.s32.totalorder %s21_s14, 0  ;;  %p32_p2 = scmp.eq.s32.totalorder %s490_s9, 0 }
   0x9   : > { %p37_p3 = scmp.ne.s32.totalorder %s482_s7, %s478_s6  ;;  %p38_p4 = scmp.eq.s32.totalorder %s531_s10, 0 }
   0xa   : > { %s547_s15 = scalar_select %p22_p1, %s486_s8, %s24_s13  }
   0xb   : > { %p549_p5 = por %p32_p2, %p31_p0  ;;  %p553_p6 = por %p38_p4, %p37_p3 }
   0xc   : > { %p61_p7 = scmp.eq.s32.totalorder %s531_s10, 1  ;;  %p67_p8 = scmp.eq.s32.totalorder %s322_s11, 1 }
   0xd   : > { %s687_s17 = scalar_select %p553_p6, 1, 0 }
   0xe   : > { %p354_p10 = scmp.lt.s32.totalorder %s490_s9, 2  ;;  %p560_p11 = por %p61_p7, %p31_p0 }
   0xf   : > { %p564_p12 = por %p67_p8, %p37_p3  ;;  %s87_s20 = sand.u32 1, %s486_s8  }
  0x10   : > { %s688_s18 = scalar_select %p560_p11, 1, 0 }
  0x11   : > { %s689_s19 = scalar_select %p564_p12, 1, 0 }
  0x12   : > { %s326_s21 = sshll.u32 %s490_s9, 7  ;;  %s325_s22 = sshll.u32 %s87_s20, 3 }
  0x13   : > { %s573_s25 = scalar_lea.hbm %s682_s0, %s326_s21  ;;  %s91_s26 = scalar_lea.vmem [#allocation2], %s325_s22 }
  0x14   : > { %s98_s27 = sshll.u32 %s91_s26, 4  ;;  %p577_p13 = pnand %p354_p10, %p549_p5  ;;  %s581_s27 = int_to_ptr.vmem [resolvable:$true] %s98_s27 }
  0x15   : > { %s88_s29 = scalar_lea.sflag [#allocation3], %s87_s20  ;;  %s398_s30 = scalar_lea.hbm %s573_s25, 128 }
  0x16   : > { %p399_p2 = scmp.ne.s32.totalorder %s573_s25, %s398_s30  ;;  %p400_p3 = pneg %p577_p13 }
  0x17   : > { %s403_s4 = scalar_lea.hbm %s682_s0, 256  ;;  %p404_p5 = scmp.lt.s32.totalorder %s573_s25, %s682_s0 }
  0x18   : > { %p401_p4 = pnand %p400_p3, %p399_p2  ;;  %p405_p8 = scmp.lt.s32.totalorder %s403_s4, %s398_s30 }
  0x1a   : > { %p402_p7 = pneg %p401_p4  ;;  %p406_p10 = por %p405_p8, %p404_p5 }
  0x1c   : > { %p407_p9 = pnand %p406_p10, %p402_p7 }
  0x1e   : > { %410 = shalt.err (!%p407_p9)
}
  0x1f   : > { %s411_s13 = scalar_lea.vmem %s581_s27, 128  ;;  %s492_s14 = smov [#allocation2]  }
  0x20   : > { %p412_p0 = scmp.ne.s32.totalorder %s581_s27, %s411_s13  ;;  %s416_s16 = sshll.u32 %s492_s14, 4  ;;  %s417_s16 = int_to_ptr.vmem [resolvable:$false] %s416_s16 }
  0x21   : > { %s418_s20 = scalar_lea.vmem %s417_s16, 256  ;;  %p419_p4 = scmp.lt.s32.totalorder %s581_s27, %s417_s16 }
  0x22   : > { %p414_p1 = pnand %p412_p0, %p400_p3  ;;  %p420_p12 = scmp.lt.s32.totalorder %s418_s20, %s411_s13 }
  0x24   : > { %p415_p2 = pneg %p414_p1  ;;  %p421_p11 = por %p420_p12, %p419_p4 }
  0x26   : > { %p422_p6 = pnand %p421_p11, %p415_p2 }
  0x28   : > { %425 = shalt.err (!%p422_p6)
}
  0x29   : > { %349 = dma.hbm_to_vmem [thread:$0]  (!%p577_p13), %s573_s25, 128, %s581_s27, %s88_s29  }
  0x2a   : > { %p691_p9 = scmp.lt.s32.totalorder %s490_s9, 3  ;;  %p692_p7 = scmp.ge.s32.totalorder %s490_s9, 1 }
  0x2c   : > { %p104_p0 = pnand %p692_p7, %p691_p9 }
  0x2d   : > { %s608_s21 = sand.u32 (!%p104_p0), 1, %s482_s7   ;;  %p693_p6 = scmp.ne.s32.totalorder (!%p104_p0), %s687_s17, 0 }
  0x2e   : > { %107 = sbr.rel (%p104_p0) target bundleno = 149 (0x95), region = 24  ;;  %s328_s22 = sshll.u32 (!%p104_p0), %s608_s21, 3 }
  0x2f   : > { %s110_s23 = scalar_lea.sflag (!%p104_p0), [#allocation3], %s608_s21  ;;  %s113_s24 = scalar_lea.vmem (!%p104_p0), [#allocation2], %s328_s22 }
  0x33   : > { %469 = dma.done.wait (%p693_p6), %s110_s23, 128  }
  0x34   : > { %471 = vsyncadd (%p693_p6), %s110_s23, 4294967168  ;;  %v618_v0 = vld [vmem:[%s113_s24] sm:$0xff]  ;;  %v493_v12 = vmov 683565275   ;;  %v494_v14 = vmov 2475754826  }
  0x35   : > { %v136_v1 = vand.u32 2139095040, %v618_v0  ;;  %v133_v3 = vand.u32 2147483647, %v618_v0  ;;  %v495_v16 = vmov 2131351028   ;;  %vm135_vm7 = vcmp.lt.s32.totalorder %v618_v0, 0 }
  0x36   : > { %v496_v18 = vmov 2102212464   ;;  %v497_v20 = vmov 920167782   ;;  %v498_v27 = vmov 1326507024   ;;  %vm225_vm12 = vweird.f32 %v618_v0 }
  0x37   : > { %v137_v2 = vshrl.u32 %v136_v1, 23  ;;  %v140_v6 = vand.u32 8388607, %v133_v3  ;;  %vm134_vm8 = vcmp.le.f32.partialorder %v133_v3, 0.7853982  ;;  %s131_s17 = scalar_lea.vmem [#allocation5], %s328_s22 }
  0x38   : > { %s252_s25 = sshll.u32 %s131_s17, 4  ;;  %s335_s26 = sshll.u32 %s531_s10, 7  ;;  %s642_s25 = int_to_ptr.vmem [resolvable:$true] %s252_s25 }
  0x39   : > { %v330_v4 = vadd.s32 4294967169, %v137_v2  ;;  %v141_v9 = vor.u32 8388608, %v140_v6  ;;  %s250_s29 = scalar_lea.hbm %s683_s1, %s335_s26  ;;  %s239_s30 = scalar_lea.sflag [#allocation4], %s608_s21 }
  0x3a   : > { %s426_s2 = scalar_lea.vmem %s642_s25, 128  ;;  %p694_p12 = scmp.ne.s32.totalorder %s688_s18, 0 }
  0x3b   : > { %v143_v5 = vadd.s32 1, %v330_v4  ;;  %v181_v29 = vshll.u32 %v141_v9, 8  ;;  %p427_p11 = scmp.ne.s32.totalorder %s642_s25, %s426_s2  ;;  %s499_s10 = smov [#allocation5]  }
  0x3c   : > { %s430_s3 = sshll.u32 %s499_s10, 4  ;;  %s431_s3 = int_to_ptr.vmem [resolvable:$false] %s430_s3 }
  0x3d   : > { %vm144_vm0 = vcmp.gt.s32.totalorder %v143_v5, 0  ;;  %p428_p13 = pnand %p427_p11, %p694_p12  ;;  %s432_s4 = scalar_lea.vmem %s431_s3, 256 }
  0x3e   : > { %v145_v7 = vsel %vm144_vm0, %v143_v5, 0  ;;  %p433_p3 = scmp.lt.s32.totalorder %s642_s25, %s431_s3  ;;  %p434_p5 = scmp.lt.s32.totalorder %s432_s4, %s426_s2 }
  0x3f   : > { %v147_v8 = vand.u32 31, %v145_v7  ;;  %v146_v10 = vshrl.u32 %v145_v7, 5  ;;  %p429_p1 = pneg %p428_p13 }
  0x40   : > { %p435_p8 = por %p434_p5, %p433_p3 }
  0x41   : > { %v148_v11 = vsub.s32 32, %v147_v8  ;;  %v150_v13 = vshll.u32 %v493_v12, %v147_v8  ;;  %v153_v15 = vshll.u32 %v494_v14, %v147_v8  ;;  %v156_v17 = vshll.u32 %v495_v16, %v147_v8 }
  0x42   : > { %v159_v19 = vshll.u32 %v496_v18, %v147_v8  ;;  %v162_v21 = vshll.u32 %v497_v20, %v147_v8  ;;  %vm165_vm1 = vcmp.lt.s32.totalorder %v146_v10, 1  ;;  %vm168_vm2 = vcmp.lt.s32.totalorder %v146_v10, 4  ;;  %p436_p10 = pnand %p435_p8, %p429_p1 }
  0x43   : > { %v149_v22 = vshrl.u32 %v493_v12, %v148_v11  ;;  %v151_v23 = vshrl.u32 %v494_v14, %v148_v11  ;;  %v154_v24 = vshrl.u32 %v495_v16, %v148_v11  ;;  %v157_v25 = vshrl.u32 %v496_v18, %v148_v11 }
  0x44   : > { %v160_v26 = vshrl.u32 %v497_v20, %v148_v11  ;;  %v163_v28 = vshrl.u32 %v498_v27, %v148_v11  ;;  %vm166_vm3 = vcmp.lt.s32.totalorder %v146_v10, 2  ;;  %vm167_vm4 = vcmp.lt.s32.totalorder %v146_v10, 3 }
  0x45   : > { %v152_v30 = vor.u32 %v151_v23, %v150_v13  ;;  %v155_v31 = vor.u32 %v154_v24, %v153_v15  ;;  %v158_v32 = vor.u32 %v157_v25, %v156_v17 }
  0x46   : > { %v161_v33 = vor.u32 %v160_v26, %v159_v19  ;;  %v164_v34 = vor.u32 %v163_v28, %v162_v21 }
  0x47   : > { %v169_v35 = vsel %vm165_vm1, %v149_v22, %v152_v30  ;;  %v170_v36 = vsel %vm168_vm2, %v158_v32, 2102212464  ;;  %v173_v37 = vsel %vm165_vm1, %v152_v30, %v155_v31  ;;  %v177_v38 = vsel %vm165_vm1, %v155_v31, %v158_v32 }
  0x48   : > { %v171_v39 = vsel %vm167_vm4, %v155_v31, %v170_v36  ;;  %v174_v40 = vsel %vm168_vm2, %v161_v33, 920167782  ;;  %v178_v41 = vsel %vm168_vm2, %v164_v34, 1326507024 }
  0x49   : > { %v175_v42 = vsel %vm167_vm4, %v158_v32, %v174_v40  ;;  %v179_v43 = vsel %vm167_vm4, %v161_v33, %v178_v41  ;;  %v172_v44 = vsel %vm166_vm3, %v169_v35, %v171_v39 }
  0x4a   : > { %v176_v45 = vsel %vm166_vm3, %v173_v37, %v175_v42  ;;  %v180_v46 = vsel %vm166_vm3, %v177_v38, %v179_v43  ;;  %v188_v51 = vmul.u32 %v181_v29, %v172_v44 }
  0x4b   : > { %v624_v47 = vmul.u32.u64.low %v181_v29, %v180_v46  ;;  %v625_v48 = vmul.u32.u64.high %v181_v29, %v180_v46, %v624_v47  ;;  %v627_v49 = vmul.u32.u64.low %v181_v29, %v176_v45  ;;  %v628_v50 = vmul.u32.u64.high %v181_v29, %v176_v45, %v627_v49 }
  0x4d   : > { %vm190_vm5 = vc.u32 %v625_v48, %v627_v49  ;;  %v191_v52 = vadd.s32 1, %v628_v50  ;;  %v189_v63 = vadd.s32 %v627_v49, %v625_v48 }
  0x4f   : > { %v192_v53 = vsel %vm190_vm5, %v191_v52, %v628_v50 }
  0x50   : > { %v193_v54 = vadd.s32 %v192_v53, %v188_v51 }
  0x52   : > { %v194_v55 = vadd.s32 536870912, %v193_v54 }
  0x54   : > { %v195_v56 = vshrl.u32 %v194_v55, 30 }
  0x56   : > { %v196_v57 = vshll.u32 %v195_v56, 30  ;;  %v219_v14 = vsub.s32 4, %v195_v56 }
  0x58   : > { %v197_v58 = vsub.s32 %v193_v54, %v196_v57  ;;  %v220_v17 = vsel %vm135_vm7, %v219_v14, %v195_v56 }
  0x59   : > { %v222_v19 = vsel %vm134_vm8, 0, %v220_v17 }
  0x5a   : > { %v199_v59 = vsub.s32 0, %v197_v58  ;;  %v226_v20 = vadd.s32 3, %v222_v19 }
  0x5c   : > { %v331_v60 = vmin.u32 %v199_v59, %v197_v58  ;;  %v227_v21 = vand.u32 3, %v226_v20 }
  0x5e   : > { %v201_v61 = vclz %v331_v60  ;;  %vm232_vm9 = vcmp.eq.s32.totalorder %v227_v21, 2  ;;  %vm229_vm10 = vcmp.eq.s32.totalorder %v227_v21, 0  ;;  %vm228_vm11 = vcmp.lt.s32.totalorder %v227_v21, 2 }
  0x60   : > { %v332_v62 = vadd.s32 4294967294, %v201_v61 }
  0x62   : > { %vm333_vm6 = vcmp.lt.s32.totalorder %v332_v62, 0 }
  0x63   : > { %v204_v1 = vsel %vm333_vm6, 0, %v332_v62 }
  0x64   : > { %v205_v2 = vsub.s32 32, %v204_v1  ;;  %v206_v4 = vshll.u32 %v197_v58, %v204_v1  ;;  %v209_v5 = vsub.s32 4294967266, %v204_v1 }
  0x66   : > { %v207_v6 = vshrl.u32 %v189_v63, %v205_v2  ;;  %v210_v7 = vadd.s32 127, %v209_v5 }
  0x68   : > { %v208_v8 = vor.u32 %v207_v6, %v206_v4  ;;  %v211_v9 = vshll.u32 %v210_v7, 23 }
  0x6a   : > { %v212_v10 = vor.u32 4788187, %v211_v9  ;;  %v215_v11 = vcvt.s32.f32 %v208_v8 }
  0x6c   : > { %v213_v12 = vand.u32 2147483647, %v212_v10 }
  0x6e   : > { %v216_v13 = vmul.f32 %v215_v11, %v213_v12 }
  0x70   : > { %v217_v15 = vxor.u32 2147483648, %v216_v13 }
  0x72   : > { %v218_v16 = vsel %vm135_vm7, %v217_v15, %v216_v13 }
  0x73   : > { %v221_v18 = vsel %vm134_vm8, %v618_v0, %v218_v16 }
  0x74   : > { %394 = vcosq.f32 %v221_v18 }
  0x75   : > { %396 = vsinq.f32 %v221_v18 }
  0x81   : > { %v395_v22 = vpop.eup %394 }
  0x82   : > { %v397_v23 = vpop.eup %396  ;;  %v233_v24 = vxor.u32 2147483648, %v395_v22 }
  0x83   : > { %v230_v3 = vxor.u32 2147483648, %v397_v23 }
  0x84   : > { %v234_v25 = vsel %vm232_vm9, %v233_v24, %v397_v23 }
  0x85   : > { %v231_v26 = vsel %vm229_vm10, %v395_v22, %v230_v3 }
  0x86   : > { %v235_v27 = vsel %vm228_vm11, %v231_v26, %v234_v25 }
  0x87   : > { %v236_v28 = vsel %vm225_vm12, nan, %v235_v27 }
  0x88   : > { %237 = vst [vmem:[%s131_s17] sm:$0xff] %v236_v28 }
  0x89   : > { %439 = shalt.err (!%p436_p10)
}
  0x8a   : > { %s440_s5 = scalar_lea.hbm %s250_s29, 128  ;;  %s444_s14 = scalar_lea.hbm %s683_s1, 256 }
  0x8b   : > { %p441_p2 = scmp.ne.s32.totalorder %s250_s29, %s440_s5  ;;  %p445_p7 = scmp.lt.s32.totalorder %s250_s29, %s683_s1 }
  0x8c   : > { %p446_p0 = scmp.lt.s32.totalorder %s444_s14, %s440_s5 }
  0x8d   : > { %p442_p4 = pnand %p441_p2, %p694_p12 }
  0x8e   : > { %p447_p6 = por %p446_p0, %p445_p7 }
  0x8f   : > { %p443_p9 = pneg %p442_p4 }
  0x91   : > { %p448_p11 = pnand %p447_p6, %p443_p9 }
  0x93   : > { %451 = shalt.err (!%p448_p11)
}
  0x94   : > { %344 = dma.vmem_to_hbm [thread:$0]  (%p694_p12), %s642_s25, 128, %s250_s29, %s239_s30  }
  0x95 PF: > { %s264_s21 = sand.u32 1, %s478_s6   ;;  %p695_p13 = scmp.ne.s32.totalorder %s689_s19, 0 }
  0x96   : > { %p696_p1 = scmp.ge.s32.totalorder %s490_s9, 2  ;;  %s265_s22 = scalar_lea.sflag [#allocation4], %s264_s21 }
  0x98   : > { %p351_p3 = pnand %p696_p1, %p695_p13 }
  0x9a   : > { %p352_p5 = pneg %p351_p3 }
  0x9c   : > { %473 = dma.done.wait (%p352_p5), %s265_s22, 128  }
  0x9d   : > { %475 = vsyncadd (%p352_p5), %s265_s22, 4294967168  ;;  %p14_p8 = scmp.ge.s32.totalorder %s535_s12, 4   ;;  %s697_s6 = smov %s482_s7 }
  0x9e   : > { %s698_s7 = smov %s486_s8  ;;  %s699_s8 = smov %s547_s15 }
  0x9f   : > { %s700_s9 = smov %s535_s12  ;;  %16 = sbr.rel (!%p14_p8) target bundleno = 5 (0x5), region = 69 }
  0xa4   :  { %270 = vsyncpa [#allocation3], 1 }
  0xa5   :  { %272 = vsyncpa [#allocation3 + $0x1], 1 }
  0xa6   :  { %273 = vsyncpa [#allocation4], 1 }
  0xa7   :  { %275 = vsyncpa [#allocation4 + $0x1], 1 }

</bundles_post_ra>
